<compile_context>
chip_gen: v7x
topology: tpu7x:2x2x1
jax: 0.10.0
libtpu: 0.0.40
codegen_flags: <defaults>
</compile_context>

<pallas_src>
import functools

import jax
import jax.numpy as jnp
import numpy as np
from jax import lax
from jax.experimental import pallas as pl
from jax.experimental.pallas import tpu as pltpu


def _nonlocal_kernel(x_ref, w_tpg_ref, b_tpg_ref, w_out_ref, b_out_ref,
                     out_ref, *, IC):
    # x_ref: (1, H1, W1, C) — one quadrant, NHWC.
    _, H1, W1, C = x_ref.shape
    Nq = H1 * W1
    hp, wp = H1 // 2, W1 // 2
    nkv = hp * wp
    C2 = 2 * IC

    x = x_ref[...].reshape(Nq, C)                 # free major-dim collapse
    x_bf = x.astype(jnp.bfloat16)

    # Fused [theta | phi | g] projection: one MXU matmul over all block pixels.
    proj = jnp.dot(x_bf, w_tpg_ref[...],
                   preferred_element_type=jnp.float32) + b_tpg_ref[...]
    theta = proj[:, :IC]                          # (Nq, IC)

    # 2x2 max-pool of the phi/g projections (reshape-based paired reduction).
    pg = proj[:, IC:].reshape(hp, 2, wp, 2, C2)
    pooled = jnp.maximum(pg[:, 0], pg[:, 1])                   # pool rows
    pooled = jnp.maximum(pooled[:, :, 0], pooled[:, :, 1])     # pool cols
    pooled = pooled.reshape(nkv, C2)
    phi = pooled[:, :IC]                          # (nkv, IC)
    gx = pooled[:, IC:]                           # (nkv, IC)

    # f = theta @ phi^T, softmax over keys (f32 softmax math).
    f = lax.dot_general(theta.astype(jnp.bfloat16), phi.astype(jnp.bfloat16),
                        (((1,), (1,)), ((), ())),
                        preferred_element_type=jnp.float32)    # (Nq, nkv)
    f = f - jnp.max(f, axis=-1, keepdims=True)
    p = jnp.exp(f)
    p = p * pl.reciprocal(jnp.sum(p, axis=-1, keepdims=True), approx=True)

    # y = softmax(f) @ g
    y = jnp.dot(p.astype(jnp.bfloat16), gx.astype(jnp.bfloat16),
                preferred_element_type=jnp.float32)            # (Nq, IC)

    # Output projection (W-conv bias + eval-mode BN affine pre-folded) +
    # residual connection (residual kept in f32).
    wy = jnp.dot(y.astype(jnp.bfloat16), w_out_ref[...],
                 preferred_element_type=jnp.float32) + b_out_ref[...]
    out_ref[...] = (wy + x).reshape(1, H1, W1, C).astype(out_ref.dtype)


def _nonlocal_pallas(x_nhwc, w_tpg, b_tpg, w_out, b_out, IC):
    B, H, W, C = x_nhwc.shape
    H1, W1 = H // 2, W // 2
    Nq = H1 * W1
    nkv = (H1 // 2) * (W1 // 2)
    G = 4 * B

    kernel = functools.partial(_nonlocal_kernel, IC=IC)

    cost = pl.CostEstimate(
        flops=2 * G * Nq * (C * 3 * IC + 2 * nkv * IC + IC * C),
        transcendentals=G * Nq * nkv,
        bytes_accessed=2 * G * Nq * C * 4)

    return pl.pallas_call(
        kernel,
        out_shape=jax.ShapeDtypeStruct((B, H, W, C), x_nhwc.dtype),
        grid=(B, 2, 2),
        in_specs=[
            # Quadrant selection lives in the index_map: block (1, H1, W1, C)
            # at block index (b, qr, qc, 0) == element offset (b, qr*H1, qc*W1, 0).
            pl.BlockSpec((1, H1, W1, C), lambda b, qr, qc: (b, qr, qc, 0)),
            pl.BlockSpec((C, 3 * IC), lambda b, qr, qc: (0, 0)),
            pl.BlockSpec((1, 3 * IC), lambda b, qr, qc: (0, 0)),
            pl.BlockSpec((IC, C), lambda b, qr, qc: (0, 0)),
            pl.BlockSpec((1, C), lambda b, qr, qc: (0, 0)),
        ],
        out_specs=pl.BlockSpec((1, H1, W1, C), lambda b, qr, qc: (b, qr, qc, 0)),
        compiler_params=pltpu.CompilerParams(
            dimension_semantics=("parallel", "parallel", "parallel")),
        cost_estimate=cost,
    )(x_nhwc, w_tpg, b_tpg, w_out, b_out)


def nonlocal_ca_forward(x_nchw, params):
    """NonLocalCA.forward: per-quadrant embedded-gaussian non-local block."""
    B, C, H, W = x_nchw.shape
    H1, W1 = H // 2, W // 2
    IC = params["w_theta"].shape[1]
    # Quadrant dims must be even (2x2 MaxPool) and W1 sublane-aligned for the
    # quadrant BlockSpec window; the demo shapes satisfy this.
    assert H1 % 2 == 0 and W1 % 2 == 0 and W1 % 8 == 0

    # Single NCHW -> NHWC conversion (only wrapper-side data movement).
    x_nhwc = jnp.transpose(x_nchw, (0, 2, 3, 1))

    # Host-side, one-time parameter fusion:
    #  * theta/phi/g 1x1-conv weights concatenated -> one projection matmul.
    #  * W-conv bias + eval-mode BN affine folded into the output weight/bias.
    #  * matmul weights pre-cast to bf16 (f32 accumulation in-kernel).
    w_tpg = jnp.concatenate(
        [params["w_theta"], params["w_phi"], params["w_g"]],
        axis=1).astype(jnp.bfloat16)                                 # (C, 3*IC)
    b_tpg = jnp.concatenate(
        [params["b_theta"], params["b_phi"], params["b_g"]], axis=1)  # (1, 3*IC)
    w_out = (params["w_w"] * params["bn_scale"]).astype(jnp.bfloat16)  # (IC, C)
    b_out = params["b_w"] * params["bn_scale"] + params["bn_shift"]    # (1, C)

    out_nhwc = _nonlocal_pallas(x_nhwc, w_tpg, b_tpg, w_out, b_out, IC)
    return jnp.transpose(out_nhwc, (0, 3, 1, 2))


def nonlocal_ca_reference(x_nchw, params):
    """Pure-JAX f32 reference (quadrant slicing done explicitly)."""
    B, C, H, W = x_nchw.shape
    H1, W1 = H // 2, W // 2
    IC = params["w_theta"].shape[1]
    hp, wp = H1 // 2, W1 // 2

    quads = jnp.stack([
        x_nchw[:, :, :H1, :W1],   # lu
        x_nchw[:, :, H1:, :W1],   # ld
        x_nchw[:, :, :H1, W1:],   # ru
        x_nchw[:, :, H1:, W1:],   # rd
    ], axis=0)                                                    # (4,B,C,H1,W1)
    G = 4 * B
    q = jnp.transpose(quads.reshape(G, C, H1, W1), (0, 2, 3, 1))  # (G,H1,W1,C)
    q = q.reshape(G, H1 * W1, C)

    theta = q @ params["w_theta"] + params["b_theta"]
    phi_f = q @ params["w_phi"] + params["b_phi"]
    g_f = q @ params["w_g"] + params["b_g"]

    def pool(v):
        v = v.reshape(G, hp, 2, wp, 2, IC)
        return v.max(axis=(2, 4)).reshape(G, hp * wp, IC)

    phi, gx = pool(phi_f), pool(g_f)
    f = jnp.einsum("gqi,gki->gqk", theta, phi)
    p = jax.nn.softmax(f, axis=-1)
    y = jnp.einsum("gqk,gki->gqi", p, gx)
    wy = y @ params["w_w"] + params["b_w"]
    z = wy * params["bn_scale"] + params["bn_shift"] + q

    out = jnp.transpose(z.reshape(G, H1, W1, C), (0, 3, 1, 2))
    out = out.reshape(4, B, C, H1, W1)
    top = jnp.concatenate([out[0], out[2]], axis=3)               # lu | ru
    bot = jnp.concatenate([out[1], out[3]], axis=3)               # ld | rd
    return jnp.concatenate([top, bot], axis=2)                    # (B,C,H,W)


def init_params(key, in_c, inter_c):
    ks = jax.random.split(key, 8)
    rnd = lambda k, shape: 0.1 * jax.random.normal(k, shape, jnp.float32)
    params = dict(
        w_theta=rnd(ks[0], (in_c, inter_c)), b_theta=rnd(ks[1], (1, inter_c)),
        w_phi=rnd(ks[2], (in_c, inter_c)),   b_phi=rnd(ks[3], (1, inter_c)),
        w_g=rnd(ks[4], (in_c, inter_c)),     b_g=rnd(ks[5], (1, inter_c)),
        w_w=rnd(ks[6], (inter_c, in_c)),     b_w=rnd(ks[7], (1, in_c)),
    )
    # Eval-mode BatchNorm2d: running_mean=0, running_var=1, eps=1e-5.
    # (PyTorch __init__ sets gamma=beta=0, which would zero out W_y; we use
    #  deterministic nonzero values so the kernel path is actually exercised.)
    gamma = 0.5 + 0.1 * jnp.arange(in_c, dtype=jnp.float32)
    beta = 0.01 * jnp.arange(in_c, dtype=jnp.float32)
    mean = jnp.zeros((in_c,), jnp.float32)
    var = jnp.ones((in_c,), jnp.float32)
    scale = gamma / jnp.sqrt(var + 1e-5)
    params["bn_scale"] = scale.reshape(1, in_c)
    params["bn_shift"] = (beta - mean * scale).reshape(1, in_c)
    return params


if __name__ == "__main__":
    key = jax.random.PRNGKey(0)
    kx, kp = jax.random.split(key)

    B, inC, n_feat, H, W = 2, 8, 4, 16, 16          # inter_channels = n_feat
    x = jax.random.normal(kx, (B, inC, H, W), jnp.float32)   # NCHW, like PyTorch
    params = init_params(kp, inC, n_feat)

    out = nonlocal_ca_forward(x, params)
    out = jax.block_until_ready(out)
    assert out.shape == (B, inC, H, W)

    ref = nonlocal_ca_reference(x, params)
    # Tolerance relaxed vs. the f32 reference: bf16 MXU operands (~4e-3
    # relative per operand) plus the approx EUP reciprocal in the softmax
    # denominator (~6e-5 relative) -> ~1e-2 absolute at these magnitudes.
    np.testing.assert_allclose(np.asarray(out), np.asarray(ref),
                               rtol=3e-2, atol=3e-2)
    print("KERNEL_OK")
</pallas_src>

<mosaic_0001>
module attributes {stable_mosaic.version = 11 : i64} {
  func.func @_nonlocal_kernel(%arg0: i32, %arg1: i32, %arg2: i32, %arg3: memref<1x8x8x8xf32, #tpu.memory_space<vmem>>, %arg4: memref<8x12xbf16, #tpu.memory_space<vmem>>, %arg5: memref<1x12xf32, #tpu.memory_space<vmem>>, %arg6: memref<4x8xbf16, #tpu.memory_space<vmem>>, %arg7: memref<1x8xf32, #tpu.memory_space<vmem>>, %arg8: memref<1x8x8x8xf32, #tpu.memory_space<vmem>>) attributes {dimension_semantics = [#tpu.dimension_semantics<parallel>, #tpu.dimension_semantics<parallel>, #tpu.dimension_semantics<parallel>], iteration_bounds = array<i64: 2, 2, 2>, scalar_prefetch = 0 : i64, scratch_operands = 0 : i64, tpu.core_type = #tpu.core_type<tc>, window_params = [{transform_indices = @transform_0, window_bounds = array<i64: 1, 8, 8, 8>}, {pipeline_mode = #tpu.pipeline_mode<synchronous>, transform_indices = @transform_1, window_bounds = array<i64: 8, 12>}, {pipeline_mode = #tpu.pipeline_mode<synchronous>, transform_indices = @transform_2, window_bounds = array<i64: 1, 12>}, {pipeline_mode = #tpu.pipeline_mode<synchronous>, transform_indices = @transform_3, window_bounds = array<i64: 4, 8>}, {pipeline_mode = #tpu.pipeline_mode<synchronous>, transform_indices = @transform_4, window_bounds = array<i64: 1, 8>}, {transform_indices = @transform_5, window_bounds = array<i64: 1, 8, 8, 8>}]} {
    %c0 = arith.constant 0 : index
    %c0_0 = arith.constant 0 : index
    %c0_1 = arith.constant 0 : index
    %c0_2 = arith.constant 0 : index
    %0 = vector.load %arg3[%c0, %c0_0, %c0_1, %c0_2] : memref<1x8x8x8xf32, #tpu.memory_space<vmem>>, vector<1x8x8x8xf32>
    %1 = vector.shape_cast %0 : vector<1x8x8x8xf32> to vector<64x8xf32>
    %2 = arith.truncf %1 : vector<64x8xf32> to vector<64x8xbf16>
    %c0_3 = arith.constant 0 : index
    %c0_4 = arith.constant 0 : index
    %3 = vector.load %arg4[%c0_3, %c0_4] : memref<8x12xbf16, #tpu.memory_space<vmem>>, vector<8x12xbf16>
    %cst = arith.constant dense<0.000000e+00> : vector<64x12xf32>
    %4 = tpu.matmul %2, %3, %cst {dimension_numbers = #tpu.dot_dimension_numbers<[1], [0], [0], [1], [0, 0, 1, 1], [], []>} : vector<64x8xbf16>, vector<8x12xbf16>, vector<64x12xf32> -> vector<64x12xf32>
    %c0_5 = arith.constant 0 : index
    %c0_6 = arith.constant 0 : index
    %5 = vector.load %arg5[%c0_5, %c0_6] : memref<1x12xf32, #tpu.memory_space<vmem>>, vector<1x12xf32>
    %6 = vector.broadcast %5 : vector<1x12xf32> to vector<64x12xf32>
    %7 = arith.addf %4, %6 : vector<64x12xf32>
    %8 = vector.extract_strided_slice %7 {offsets = [0, 0], sizes = [64, 4], strides = [1, 1]} : vector<64x12xf32> to vector<64x4xf32>
    %9 = vector.extract_strided_slice %7 {offsets = [0, 4], sizes = [64, 8], strides = [1, 1]} : vector<64x12xf32> to vector<64x8xf32>
    %10 = vector.shape_cast %9 : vector<64x8xf32> to vector<4x2x4x2x8xf32>
    %11 = vector.extract_strided_slice %10 {offsets = [0, 0, 0, 0, 0], sizes = [4, 1, 4, 2, 8], strides = [1, 1, 1, 1, 1]} : vector<4x2x4x2x8xf32> to vector<4x1x4x2x8xf32>
    %12 = vector.shape_cast %11 : vector<4x1x4x2x8xf32> to vector<4x4x2x8xf32>
    %13 = vector.extract_strided_slice %10 {offsets = [0, 1, 0, 0, 0], sizes = [4, 1, 4, 2, 8], strides = [1, 1, 1, 1, 1]} : vector<4x2x4x2x8xf32> to vector<4x1x4x2x8xf32>
    %14 = vector.shape_cast %13 : vector<4x1x4x2x8xf32> to vector<4x4x2x8xf32>
    %15 = arith.maximumf %12, %14 : vector<4x4x2x8xf32>
    %16 = vector.extract_strided_slice %15 {offsets = [0, 0, 0, 0], sizes = [4, 4, 1, 8], strides = [1, 1, 1, 1]} : vector<4x4x2x8xf32> to vector<4x4x1x8xf32>
    %17 = vector.shape_cast %16 : vector<4x4x1x8xf32> to vector<4x4x8xf32>
    %18 = vector.extract_strided_slice %15 {offsets = [0, 0, 1, 0], sizes = [4, 4, 1, 8], strides = [1, 1, 1, 1]} : vector<4x4x2x8xf32> to vector<4x4x1x8xf32>
    %19 = vector.shape_cast %18 : vector<4x4x1x8xf32> to vector<4x4x8xf32>
    %20 = arith.maximumf %17, %19 : vector<4x4x8xf32>
    %21 = vector.shape_cast %20 : vector<4x4x8xf32> to vector<16x8xf32>
    %22 = vector.extract_strided_slice %21 {offsets = [0, 0], sizes = [16, 4], strides = [1, 1]} : vector<16x8xf32> to vector<16x4xf32>
    %23 = vector.extract_strided_slice %21 {offsets = [0, 4], sizes = [16, 4], strides = [1, 1]} : vector<16x8xf32> to vector<16x4xf32>
    %24 = arith.truncf %8 : vector<64x4xf32> to vector<64x4xbf16>
    %25 = arith.truncf %22 : vector<16x4xf32> to vector<16x4xbf16>
    %cst_7 = arith.constant dense<0.000000e+00> : vector<64x16xf32>
    %26 = tpu.matmul %24, %25, %cst_7 {dimension_numbers = #tpu.dot_dimension_numbers<[1], [1], [0], [0], [0, 0, 1, 0], [], []>} : vector<64x4xbf16>, vector<16x4xbf16>, vector<64x16xf32> -> vector<64x16xf32>
    %cst_8 = arith.constant dense<0xFF800000> : vector<64xf32>
    %27 = vector.multi_reduction <maximumf>, %26, %cst_8 [1] : vector<64x16xf32> to vector<64xf32>
    %28 = vector.shape_cast %27 : vector<64xf32> to vector<64x1xf32>
    %29 = vector.broadcast %28 : vector<64x1xf32> to vector<64x16xf32>
    %30 = arith.subf %26, %29 : vector<64x16xf32>
    %31 = math.exp %30 : vector<64x16xf32>
    %cst_9 = arith.constant dense<0.000000e+00> : vector<64xf32>
    %32 = vector.multi_reduction <add>, %31, %cst_9 [1] : vector<64x16xf32> to vector<64xf32>
    %33 = vector.shape_cast %32 : vector<64xf32> to vector<64x1xf32>
    %34 = tpu.reciprocal %33 {approx = true} : vector<64x1xf32> -> vector<64x1xf32>
    %35 = vector.broadcast %34 : vector<64x1xf32> to vector<64x16xf32>
    %36 = arith.mulf %31, %35 : vector<64x16xf32>
    %37 = arith.truncf %36 : vector<64x16xf32> to vector<64x16xbf16>
    %38 = arith.truncf %23 : vector<16x4xf32> to vector<16x4xbf16>
    %cst_10 = arith.constant dense<0.000000e+00> : vector<64x4xf32>
    %39 = tpu.matmul %37, %38, %cst_10 {dimension_numbers = #tpu.dot_dimension_numbers<[1], [0], [0], [1], [0, 0, 1, 1], [], []>} : vector<64x16xbf16>, vector<16x4xbf16>, vector<64x4xf32> -> vector<64x4xf32>
    %40 = arith.truncf %39 : vector<64x4xf32> to vector<64x4xbf16>
    %c0_11 = arith.constant 0 : index
    %c0_12 = arith.constant 0 : index
    %41 = vector.load %arg6[%c0_11, %c0_12] : memref<4x8xbf16, #tpu.memory_space<vmem>>, vector<4x8xbf16>
    %cst_13 = arith.constant dense<0.000000e+00> : vector<64x8xf32>
    %42 = tpu.matmul %40, %41, %cst_13 {dimension_numbers = #tpu.dot_dimension_numbers<[1], [0], [0], [1], [0, 0, 1, 1], [], []>} : vector<64x4xbf16>, vector<4x8xbf16>, vector<64x8xf32> -> vector<64x8xf32>
    %c0_14 = arith.constant 0 : index
    %c0_15 = arith.constant 0 : index
    %43 = vector.load %arg7[%c0_14, %c0_15] : memref<1x8xf32, #tpu.memory_space<vmem>>, vector<1x8xf32>
    %44 = vector.broadcast %43 : vector<1x8xf32> to vector<64x8xf32>
    %45 = arith.addf %42, %44 : vector<64x8xf32>
    %46 = arith.addf %45, %1 : vector<64x8xf32>
    %47 = vector.shape_cast %46 : vector<64x8xf32> to vector<1x8x8x8xf32>
    %c0_16 = arith.constant 0 : index
    %c0_17 = arith.constant 0 : index
    %c0_18 = arith.constant 0 : index
    %c0_19 = arith.constant 0 : index
    %48 = vector.load %arg8[%c0_16, %c0_17, %c0_18, %c0_19] : memref<1x8x8x8xf32, #tpu.memory_space<vmem>>, vector<1x8x8x8xf32>
    tpu.vector_store %arg8[%c0_16, %c0_17, %c0_18, %c0_19], %47 {strides = array<i32>} : memref<1x8x8x8xf32, #tpu.memory_space<vmem>>, vector<1x8x8x8xf32>,
    return
  }
  func.func @transform_0(%arg0: i32, %arg1: i32, %arg2: i32) -> (i32, i32, i32, i32) {
    %c0_i32 = arith.constant 0 : i32
    %c0_i32_0 = arith.constant 0 : i32
    return %arg0, %arg1, %arg2, %c0_i32 : i32, i32, i32, i32
  }
  func.func @transform_1(%arg0: i32, %arg1: i32, %arg2: i32) -> (i32, i32) {
    %c0_i32 = arith.constant 0 : i32
    %c0_i32_0 = arith.constant 0 : i32
    %c0_i32_1 = arith.constant 0 : i32
    return %c0_i32, %c0_i32_0 : i32, i32
  }
  func.func @transform_2(%arg0: i32, %arg1: i32, %arg2: i32) -> (i32, i32) {
    %c0_i32 = arith.constant 0 : i32
    %c0_i32_0 = arith.constant 0 : i32
    %c0_i32_1 = arith.constant 0 : i32
    return %c0_i32, %c0_i32_0 : i32, i32
  }
  func.func @transform_3(%arg0: i32, %arg1: i32, %arg2: i32) -> (i32, i32) {
    %c0_i32 = arith.constant 0 : i32
    %c0_i32_0 = arith.constant 0 : i32
    %c0_i32_1 = arith.constant 0 : i32
    return %c0_i32, %c0_i32_0 : i32, i32
  }
  func.func @transform_4(%arg0: i32, %arg1: i32, %arg2: i32) -> (i32, i32) {
    %c0_i32 = arith.constant 0 : i32
    %c0_i32_0 = arith.constant 0 : i32
    %c0_i32_1 = arith.constant 0 : i32
    return %c0_i32, %c0_i32_0 : i32, i32
  }
  func.func @transform_5(%arg0: i32, %arg1: i32, %arg2: i32) -> (i32, i32, i32, i32) {
    %c0_i32 = arith.constant 0 : i32
    %c0_i32_0 = arith.constant 0 : i32
    return %arg0, %arg1, %arg2, %c0_i32 : i32, i32, i32, i32
  }
}

</mosaic_0001>

<bundles_post_ra>
// kernel: tpu_custom_call.1
= control target key start
LH: loop header
LB: loop body
LE: loop exit
PB: predicated region body
PF: predicated region fallthrough
CT: control target
= control target key end

     0   :  { %s1629_s18 = smov 0   ;;  %s1631_s19 = smov 0   ;;  %s1990_s0 = inlined_call_operand.vmem [shape: f32[2,16,16,8], index: 0, kind: input, shape index: {}]   ;;  %s1991_s1 = inlined_call_operand.vmem [shape: bf16[8,12], index: 1, kind: input, shape index: {}]   ;;  %s1992_s2 = inlined_call_operand.vmem [shape: f32[1,12], index: 2, kind: input, shape index: {}]   ;;  %s1993_s3 = inlined_call_operand.vmem [shape: bf16[4,8], index: 3, kind: input, shape index: {}]   ;;  %s1994_s4 = inlined_call_operand.vmem [shape: f32[1,8], index: 4, kind: input, shape index: {}]   ;;  %s1995_s5 = inlined_call_operand.vmem [shape: f32[2,16,16,8], index: 5, kind: output, shape index: {}]  }
   0x1   :  { %s1633_s20 = smov 0   ;;  %s1635_s21 = smov 0  }
   0x2   :  { %s1637_s22 = smov 0   ;;  %s1639_s23 = smov 0  }
   0x3   :  { %s1641_s24 = smov 0   ;;  %s1643_s25 = smov 0  }
   0x4   :  { %s1645_s26 = smov 0  }
   0x5 LB: > { %s27_s27 = sadd.s32 1, %s1582_s23  ;;  %s30_s28 = sadd.s32 1, %s1586_s24  ;;  %s1594_s26 = sphi %s1645_s26, %s15_s26   ;;  %s1590_s25 = sphi %s1643_s25, %s2005_s25   ;;  %s1586_s24 = sphi %s1641_s24, %s2004_s24   ;;  %s1582_s23 = sphi %s1639_s23, %s2003_s23   ;;  %s1578_s22 = sphi %s1637_s22, %s2002_s22   ;;  %s1574_s21 = sphi %s1635_s21, %s2001_s21   ;;  %s1570_s20 = sphi %s1633_s20, %s2000_s20   ;;  %s1566_s19 = sphi %s1631_s19, %s1999_s19   ;;  %s1562_s18 = sphi %s1629_s18, %s1998_s18  }
   0x6   : > { %p28_p0 = scmp.ge.s32.totalorder %s27_s27, 2  ;;  %s1299_s29 = sadd.s32 4294967295, %s1594_s26  }
   0x7   : > { %s34_s30 = sadd.s32 1, %s1590_s25  ;;  %p52_p1 = scmp.ne.s32.totalorder %s1566_s19, %s1562_s18 }
   0x8   : > { %s2007_s27 = smov (%p28_p0, %s27_s27), 0  ;;  %s2009_s28 = smov (!%p28_p0, %s30_s28), %s1586_s24 }
   0x9   : > { %p32_p2 = scmp.ge.s32.totalorder %s2009_s28, 2  ;;  %p53_p3 = scmp.eq.s32.totalorder %s1594_s26, 0 }
   0xa   : > { %p170_p4 = scmp.eq.s32.totalorder %s1299_s29, 7  ;;  %s41_s9 = ssub.s32 %s1582_s23, %s2007_s27 }
   0xb   : > { %s2011_s28 = smov (%p32_p2, %s2009_s28), 0  ;;  %s2013_s30 = smov (!%p32_p2, %s34_s30), %s1590_s25 }
   0xc   : > { %p1687_p5 = por %p53_p3, %p52_p1  ;;  %p36_p6 = scmp.ge.s32.totalorder %s2013_s30, 2 }
   0xd   : > { %p1691_p7 = por %p170_p4, %p52_p1  ;;  %s39_s8 = ssub.s32 %s1586_s24, %s2011_s28 }
   0xe   : > { %s2015_s30 = smov (%p36_p6, %s2013_s30), 0  ;;  %s45_s13 = sadd.s32 1, %s1566_s19 }
   0xf   : > { %s38_s10 = ssub.s32 %s1590_s25, %s2015_s30  ;;  %p1302_p9 = scmp.ge.s32.totalorder %s1594_s26, 8 }
  0x10   : > { %s40_s11 = sor.u32 %s39_s8, %s38_s10 }
  0x11   : > { %s42_s12 = sor.u32 %s41_s9, %s40_s11  ;;  %204 = sbr.rel (%p1302_p9) target bundleno = 35 (0x23), region = 32 }
  0x12   : > { %p43_p8 = scmp.eq.s32.totalorder %s42_s12, 0 }
  0x14   : > { %s1705_s14 = scalar_select %p43_p8, %s1566_s19, %s45_s13  }
  0x18   : > { %207 = sbr.rel (!%p1687_p5) target bundleno = 35 (0x23), region = 36  ;;  %s209_s15 = sand.u32 (%p1687_p5), 1, %s1566_s19  }
  0x19   : > { %s1352_s16 = sshll.u32 (%p1687_p5), %s1586_s24, 4  ;;  %s1303_s17 = sshll.u32 (%p1687_p5), %s209_s15, 6 }
  0x1a   : > { %s214_s29 = sadd.s32 (%p1687_p5), %s1582_s23, %s1352_s16  ;;  %s1306_s8 = sshll.u32 (%p1687_p5), %s1590_s25, 5 }
  0x1b   : > { %s216_s9 = sadd.s32 (%p1687_p5), %s1306_s8, %s214_s29  ;;  %s211_s6 = scalar_lea.vmem (%p1687_p5), [#allocation2], %s1303_s17 }
  0x1c   : > { %s1307_s10 = sshll.u32 (%p1687_p5), %s216_s9, 3 }
  0x1d   : > { %s218_s13 = scalar_lea.vmem (%p1687_p5), %s1990_s0, %s1307_s10 }
  0x1e   : > { %v260_v0 = vld [vmem:[%s218_s13] sm:$0xff] (%p1687_p5)  ;;  %v262_v1 = vld [vmem:[%s218_s13 + $0x10] sm:$0xff] (%p1687_p5) }
  0x1f   : > { %v264_v2 = vld [vmem:[%s218_s13 + $0x20] sm:$0xff]  ;;  %261 = vst [vmem:[%s211_s6] sm:$0xff] %v260_v0  ;;  %263 = vst [vmem:[%s211_s6 + $0x8] sm:$0xff] %v262_v1  ;;  %v266_v3 = vld [vmem:[%s218_s13 + $0x30] sm:$0xff] }
  0x20   : > { %265 = vst [vmem:[%s211_s6 + $0x10] sm:$0xff] %v264_v2  ;;  %v268_v4 = vld [vmem:[%s218_s13 + $0x40] sm:$0xff]  ;;  %v270_v5 = vld [vmem:[%s218_s13 + $0x50] sm:$0xff]  ;;  %267 = vst [vmem:[%s211_s6 + $0x18] sm:$0xff] %v266_v3 }
  0x21   : > { %269 = vst [vmem:[%s211_s6 + $0x20] sm:$0xff] %v268_v4  ;;  %271 = vst [vmem:[%s211_s6 + $0x28] sm:$0xff] %v270_v5  ;;  %v272_v6 = vld [vmem:[%s218_s13 + $0x60] sm:$0xff]  ;;  %v274_v7 = vld [vmem:[%s218_s13 + $0x70] sm:$0xff] }
  0x22   : > { %273 = vst [vmem:[%s211_s6 + $0x30] sm:$0xff] %v272_v6  ;;  %275 = vst [vmem:[%s211_s6 + $0x38] sm:$0xff] %v274_v7 }
  0x23 PF: > { %p1308_p10 = scmp.ge.s32.totalorder %s1594_s26, 1  ;;  %p280_p11 = scmp.lt.s32.totalorder %s1594_s26, 9 }
  0x25   : > { %p281_p12 = pnand %p1308_p10, %p280_p11 }
  0x26   : > { %v328_v8 = vld [vmem:[%s1991_s1] sm:$0xf] (!%p281_p12)  ;;  %vm349_vm0 = vcmask (!%p281_p12), 1043456   ;;  %s287_s17 = sand.u32 (!%p281_p12), 1, %s1562_s18   ;;  %vm336_vm1 = vcmask (!%p281_p12), 64512   ;;  %v430_v24 = vlaneseq (!%p281_p12)  ;;  %vm780_vm2 = vcmask (!%p281_p12), 31744  }
  0x27   : > { %284 = sbr.rel (%p281_p12) target bundleno = 1425 (0x591), region = 74  ;;  %1414 = vmatprep.subr.msk.bf16.mxu0 (!%p281_p12), %vm349_vm0, %v328_v8  ;;  %v351_v9 = vsel (!%p281_p12), %vm349_vm0, %v328_v8, 0  ;;  %s1723_s29 = sshll.u32 (!%p281_p12), %s287_s17, 6  ;;  %v1596_v22 = vmov (!%p281_p12), 1983009808   ;;  %vm743_vm3 = vcmask (!%p281_p12), 1041409  }
  0x28   : > { %1375 = vmatpush3.bf16.msra.mxu0 (!%p281_p12), %v351_v9  ;;  %s289_s8 = scalar_lea.vmem (!%p281_p12), [#allocation2], %s1723_s29  ;;  %v428_v23 = vunpack.c.l.s4 (!%p281_p12), %v1596_v22  ;;  %v431_v26 = vshrl.u32 (!%p281_p12), %v430_v24, 7  ;;  %v1757_v27 = vld [vmem:[%s1992_s2] ss:$0 sm:$0xff] (!%p281_p12)  ;;  %vm746_vm4 = vcmask (!%p281_p12), 1042434   ;;  %vm749_vm5 = vcmask (!%p281_p12), 1043459  }
  0x29   : > { %v1726_v10 = vld [vmem:[%s289_s8] sm:$0xff] (!%p281_p12)  ;;  %v1728_v11 = vld [vmem:[%s289_s8 + $0x8] sm:$0xff] (!%p281_p12)  ;;  %v1730_v12 = vld [vmem:[%s289_s8 + $0x10] sm:$0xff] (!%p281_p12)  ;;  %vm752_vm6 = vcmask (!%p281_p12), 1044484   ;;  %vm755_vm7 = vcmask (!%p281_p12), 1045509   ;;  %vm758_vm8 = vcmask (!%p281_p12), 1046534  }
  0x2a   : > { %v324_v13 = vpack.c.bf16 (!%p281_p12), %v1728_v11, %v1726_v10  ;;  %v1734_v14 = vld [vmem:[%s289_s8 + $0x18] sm:$0xff] (!%p281_p12)  ;;  %v1736_v15 = vld [vmem:[%s289_s8 + $0x20] sm:$0xff] (!%p281_p12)  ;;  %v1738_v16 = vld [vmem:[%s289_s8 + $0x28] sm:$0xff] (!%p281_p12)  ;;  %v429_v25 = vunpack.c.0.s8 (!%p281_p12), %v428_v23  ;;  %vm761_vm9 = vcmask (!%p281_p12), 1047559   ;;  %s1597_s10 = smov (!%p281_p12), 124   ;;  %vm861_vm10 = vcmask (!%p281_p12), 130048  }
  0x2b   : > { %v325_v17 = vpack.c.bf16 (!%p281_p12), %v1734_v14, %v1730_v12  ;;  %v326_v18 = vpack.c.bf16 (!%p281_p12), %v1738_v16, %v1736_v15  ;;  %v1747_v19 = vld [vmem:[%s289_s8 + $0x30] sm:$0xff] (!%p281_p12)  ;;  %v1749_v20 = vld [vmem:[%s289_s8 + $0x38] sm:$0xff] (!%p281_p12)  ;;  %s1598_s11 = smov (!%p281_p12), 120   ;;  %vm1058_vm11 = vcmask (!%p281_p12), 1041408   ;;  %s1923_s16 = scalar_lea.vmem (!%p281_p12), [#allocation3], %s1723_s29 }
  0x2c   : > { %1376 = vmatprep.mubr.msk.bf16.mxu0 (!%p281_p12), %vm336_vm1, %v324_v13  ;;  %v327_v21 = vpack.c.bf16 (!%p281_p12), %v1749_v20, %v1747_v19  ;;  %v1759_v28 = vsub.s32 (!%p281_p12), %v429_v25, %v431_v26 }
  0x2d   : > { %1377 = vmatmul.mubr.msk.bf16.vlgmr.msra.gmra.mrb[0].mxu0 (!%p281_p12), %vm336_vm1, %v325_v17 }
  0x2e   : > { %1380 = vmatprep.mubr.msk.bf16.mxu0 %vm336_vm1, %v326_v18  ;;  %s1353_s17 = sshll.u32 (%p1691_p7), %s1574_s21, 4  ;;  %s1348_s29 = sshll.u32 (%p1691_p7), %s1578_s22, 5 }
  0x2f   : > { %s1152_s8 = sadd.s32 (%p1691_p7), %s1570_s20, %s1353_s17 }
  0x30   : > { %s1154_s7 = sadd.s32 (%p1691_p7), %s1348_s29, %s1152_s8 }
  0x31   : > { %s1349_s18 = sshll.u32 (%p1691_p7), %s1154_s7, 3 }
  0x35   : > { %1381 = vmatmul.mubr.msk.bf16.gmra.mrb[4].mxu0 %vm336_vm1, %v327_v21 }
 0x100   : > { %v1378_v29 = vpop.f32.mrb[0].mxu0 }
 0x101   : > { %v1762_v30 = vadd.f32 %v1378_v29, %v1757_v27  ;;  %v387_v31 = vpop.f32.mrb[1].mxu0 }
 0x102   : > { %v388_v32 = vadd.f32 %v1757_v27, %v387_v31  ;;  %v1379_v33 = vpop.f32.mrb[2].mxu0 }
 0x103   : > { %v460_v34 = vcombine.high %v1762_v30, %v1762_v30  ;;  %v467_v35 = vrot.slane %v1762_v30, %v1759_v28  ;;  %v1770_v36 = vadd.f32 %v1379_v33, %v1757_v27  ;;  %v390_v37 = vpop.f32.mrb[3].mxu0 }
 0x104   : > { %v426_v38 = vcombine.high %v388_v32, %v388_v32  ;;  %v433_v39 = vrot.slane %v388_v32, %v1759_v28  ;;  %v391_v40 = vadd.f32 %v1757_v27, %v390_v37 }
 0x105   : > { %v477_v41 = vcombine.high %v1770_v36, %v1770_v36  ;;  %v484_v42 = vrot.slane %v1770_v36, %v1759_v28  ;;  %v1779_v43 = vrot.slane %v460_v34, %v1759_v28  ;;  %v691_v45 = vpack.c.bf16 %v1770_v36, %v1762_v30 }
 0x106   : > { %v440_v44 = vrot.slane %v426_v38, %v1759_v28  ;;  %v443_v46 = vcombine.high %v391_v40, %v391_v40  ;;  %v475_v47 = vcombine.high %v467_v35, %v467_v35  ;;  %v441_v51 = vcombine.high %v433_v39, %v433_v39 }
 0x107   : > { %v1785_v48 = vrot.slane %v477_v41, %v1759_v28  ;;  %v492_v49 = vcombine.high %v484_v42, %v484_v42  ;;  %v598_v50 = vmax.f32 %v467_v35, %v484_v42  ;;  %v450_v52 = vrot.slane %v391_v40, %v1759_v28 }
 0x108   : > { %v457_v53 = vrot.slane %v443_v46, %v1759_v28  ;;  %v1382_v54 = vpop.f32.mrb[4].mxu0  ;;  %v690_v55 = vpack.c.bf16 %v391_v40, %v388_v32  ;;  %v442_v56 = vcombine.high %v440_v44, %v440_v44  ;;  %v476_v26 = vcombine.high %v1779_v43, %v1779_v43 }
 0x109   : > { %v599_v57 = vmax.f32 %v475_v47, %v492_v49  ;;  %v1791_v58 = vmax.f32 %v1779_v43, %v1785_v48  ;;  %v1320_v59 = vrot.slane %v598_v50, 9  ;;  %v403_v60 = vpop.f32.mrb[5].mxu0  ;;  %v458_v61 = vcombine.high %v450_v52, %v450_v52 }
 0x10a   : > { %v459_v62 = vcombine.high %v457_v53, %v457_v53  ;;  %v594_v63 = vmax.f32 %v433_v39, %v450_v52  ;;  %v596_v0 = vmax.f32 %v440_v44, %v457_v53  ;;  %1386 = vmatprep.mubr.msk.bf16.mxu1 %vm780_vm2, %v690_v55  ;;  %v1383_v1 = vpop.f32.mrb[6].mxu0  ;;  %v1795_v4 = vadd.f32 %v1382_v54, %v1757_v27 }
 0x10b   : > { %v1321_v2 = vrot.slane %v599_v57, 9  ;;  %v678_v3 = vmax.f32 %v598_v50, %v1320_v59  ;;  %v406_v5 = vpop.f32.mrb[7].mxu0  ;;  %v595_v6 = vmax.f32 %v441_v51, %v458_v61  ;;  %v493_v29 = vcombine.high %v1785_v48, %v1785_v48 }
 0x10c   : > { %v597_v7 = vmax.f32 %v442_v56, %v459_v62  ;;  %v1316_v8 = vrot.slane %v594_v63, 9  ;;  %v1318_v9 = vrot.slane %v596_v0, 9  ;;  %v528_v18 = vcombine.high %v1795_v4, %v1795_v4 }
 0x10d   : > { %v1797_v13 = vmax.f32 %v599_v57, %v1321_v2  ;;  %v698_v17 = vpack.c.bf16 %v678_v3, %v678_v3  ;;  %v535_v21 = vrot.slane %v1795_v4, %v1759_v28  ;;  %v1317_v22 = vrot.slane %v595_v6, 9 }
 0x10e   : > { %v1319_v23 = vrot.slane %v597_v7, 9  ;;  %v674_v24 = vmax.f32 %v594_v63, %v1316_v8  ;;  %v676_v25 = vmax.f32 %v596_v0, %v1318_v9  ;;  %v542_v35 = vrot.slane %v528_v18, %v1759_v28 }
 0x10f   : > { %v1807_v31 = vunpack.c.l.b16 %v698_v17  ;;  %v675_v32 = vmax.f32 %v595_v6, %v1317_v22  ;;  %v1322_v37 = vrot.slane %v1791_v58, 9  ;;  %v1812_v39 = vadd.f32 %v1757_v27, %v403_v60 }
 0x110   : > { %v677_v33 = vmax.f32 %v597_v7, %v1319_v23  ;;  %v694_v34 = vpack.c.bf16 %v674_v24, %v674_v24  ;;  %v696_v38 = vpack.c.bf16 %v676_v25, %v676_v25  ;;  %v1815_v40 = vadd.f32 %v1383_v1, %v1757_v27 }
 0x111   : > { %v699_v41 = vpack.c.bf16 %v1797_v13, %v1797_v13  ;;  %v695_v42 = vpack.c.bf16 %v675_v32, %v675_v32  ;;  %v543_v44 = vcombine.high %v535_v21, %v535_v21  ;;  %v751_v46 = vrot.slane %v1807_v31, 4 }
 0x112   : > { %v697_v43 = vpack.c.bf16 %v677_v33, %v677_v33  ;;  %v494_v47 = vcombine.high %v1812_v39, %v1812_v39  ;;  %v545_v48 = vcombine.high %v1815_v40, %v1815_v40  ;;  %v552_v49 = vrot.slane %v1815_v40, %v1759_v28 }
 0x113   : > { %v726_v50 = vunpack.c.l.b16 %v694_v34  ;;  %v727_v51 = vunpack.c.l.b16 %v695_v42  ;;  %v544_v52 = vcombine.high %v542_v35, %v542_v35  ;;  %v693_v53 = vpack.c.bf16 %v1815_v40, %v1795_v4 }
 0x114   : > { %v1828_v54 = vunpack.c.l.b16 %v696_v38  ;;  %v501_v55 = vrot.slane %v1812_v39, %v1759_v28  ;;  %v559_v56 = vrot.slane %v545_v48, %v1759_v28  ;;  %v560_v57 = vcombine.high %v552_v49, %v552_v49 }
 0x115   : > { %v1833_v59 = vunpack.c.l.b16 %v697_v43  ;;  %v742_v60 = vrot.slane %v727_v51, 7  ;;  %v606_v61 = vmax.f32 %v535_v21, %v552_v49  ;;  %v1836_v62 = vadd.f32 %v1757_v27, %v406_v5 }
 0x116   : > { %v508_v63 = vrot.slane %v494_v47, %v1759_v28  ;;  %v561_v0 = vcombine.high %v559_v56, %v559_v56  ;;  %v607_v1 = vmax.f32 %v543_v44, %v560_v57  ;;  %v608_v2 = vmax.f32 %v542_v35, %v559_v56 }
 0x117   : > { %v744_v3 = vsel %vm743_vm3, %v742_v60, %v726_v50  ;;  %v1328_v6 = vrot.slane %v606_v61, 9  ;;  %v511_v7 = vcombine.high %v1836_v62, %v1836_v62  ;;  %v518_v8 = vrot.slane %v1836_v62, %v1759_v28 }
 0x118   : > { %v509_v9 = vcombine.high %v501_v55, %v501_v55  ;;  %v1329_v17 = vrot.slane %v607_v1, 9  ;;  %v692_v27 = vpack.c.bf16 %v1836_v62, %v1812_v39  ;;  %v601_v5 = vmax.f32 %v476_v26, %v493_v29 }
 0x119   : > { %v686_v18 = vmax.f32 %v606_v61, %v1328_v6  ;;  %v525_v21 = vrot.slane %v511_v7, %v1759_v28  ;;  %v526_v22 = vcombine.high %v518_v8, %v518_v8  ;;  %v602_v23 = vmax.f32 %v501_v55, %v518_v8 }
 0x11a   : > { %v1330_v24 = vrot.slane %v608_v2, 9  ;;  %v609_v25 = vmax.f32 %v544_v52, %v561_v0  ;;  %v1323_v32 = vrot.slane %v601_v5, 9  ;;  %v680_v33 = vmax.f32 %v1791_v58, %v1322_v37 }
 0x11b   : > { %v510_v34 = vcombine.high %v508_v63, %v508_v63  ;;  %v527_v35 = vcombine.high %v525_v21, %v525_v21  ;;  %v603_v38 = vmax.f32 %v509_v9, %v526_v22  ;;  %v604_v42 = vmax.f32 %v508_v63, %v525_v21 }
 0x11c   : > { %v687_v43 = vmax.f32 %v607_v1, %v1329_v17  ;;  %v1324_v44 = vrot.slane %v602_v23, 9  ;;  %v1331_v26 = vrot.slane %v609_v25, 9  ;;  %v681_v29 = vmax.f32 %v601_v5, %v1323_v32 }
 0x11d   : > { %v706_v28 = vpack.c.bf16 %v686_v18, %v686_v18  ;;  %v605_v47 = vmax.f32 %v510_v34, %v527_v35  ;;  %v1325_v48 = vrot.slane %v603_v38, 9  ;;  %v1326_v49 = vrot.slane %v604_v42, 9 }
 0x11e   : > { %v682_v50 = vmax.f32 %v602_v23, %v1324_v44  ;;  %v688_v51 = vmax.f32 %v608_v2, %v1330_v24  ;;  %v689_v52 = vmax.f32 %v609_v25, %v1331_v26  ;;  %v700_v58 = vpack.c.bf16 %v680_v33, %v680_v33 }
 0x11f   : > { %v745_v37 = vrot.slane %v1828_v54, 6  ;;  %v1327_v55 = vrot.slane %v605_v47, 9  ;;  %v683_v56 = vmax.f32 %v603_v38, %v1325_v48  ;;  %v684_v57 = vmax.f32 %v604_v42, %v1326_v49 }
 0x120   : > { %v748_v60 = vrot.slane %v1833_v59, 5  ;;  %v707_v61 = vpack.c.bf16 %v687_v43, %v687_v43  ;;  %v702_v63 = vpack.c.bf16 %v682_v50, %v682_v50  ;;  %v701_v0 = vpack.c.bf16 %v681_v29, %v681_v29 }
 0x121   : > { %v685_v1 = vmax.f32 %v605_v47, %v1327_v55  ;;  %v703_v6 = vpack.c.bf16 %v683_v56, %v683_v56  ;;  %v704_v7 = vpack.c.bf16 %v684_v57, %v684_v57  ;;  %v731_v2 = vunpack.c.l.b16 %v699_v41 }
 0x122   : > { %v738_v8 = vunpack.c.l.b16 %v706_v28  ;;  %v708_v9 = vpack.c.bf16 %v688_v51, %v688_v51  ;;  %v709_v17 = vpack.c.bf16 %v689_v52, %v689_v52  ;;  %v732_v5 = vunpack.c.l.b16 %v700_v58 }
 0x123   : > { %v705_v54 = vpack.c.bf16 %v685_v1, %v685_v1  ;;  %v735_v18 = vunpack.c.l.b16 %v703_v6  ;;  %v736_v21 = vunpack.c.l.b16 %v704_v7  ;;  %v733_v22 = vunpack.c.l.b16 %v701_v0 }
 0x124   : > { %v734_v23 = vunpack.c.l.b16 %v702_v63  ;;  %v739_v59 = vunpack.c.l.b16 %v707_v61  ;;  %v747_v24 = vsel %vm746_vm4, %v745_v37, %v744_v3  ;;  %v754_v25 = vrot.slane %v731_v2, 3 }
 0x125   : > { %v737_v32 = vunpack.c.l.b16 %v705_v54  ;;  %v763_v33 = vrot.slane %v735_v18, 7  ;;  %v765_v34 = vrot.slane %v736_v21, 6  ;;  %v750_v35 = vsel %vm749_vm5, %v748_v60, %v747_v24 }
 0x126   : > { %v740_v13 = vunpack.c.l.b16 %v708_v9  ;;  %v741_v41 = vunpack.c.l.b16 %v709_v17  ;;  %v753_v38 = vsel %vm752_vm6, %v751_v46, %v750_v35  ;;  %v757_v42 = vrot.slane %v732_v5, 2 }
 0x127   : > { %v764_v43 = vsel %vm743_vm3, %v763_v33, %v734_v23  ;;  %v767_v44 = vrot.slane %v737_v32, 5  ;;  %v756_v26 = vsel %vm755_vm7, %v754_v25, %v753_v38  ;;  %v760_v29 = vrot.slane %v733_v22, 1 }
 0x128   : > { %v769_v3 = vrot.slane %v738_v8, 4  ;;  %v759_v28 = vsel %vm758_vm8, %v757_v42, %v756_v26  ;;  %v766_v47 = vsel %vm746_vm4, %v765_v34, %v764_v43  ;;  %v771_v50 = vrot.slane %v739_v59, 3 }
 0x129   : > { %v762_v48 = vsel %vm761_vm9, %v760_v29, %v759_v28  ;;  %v768_v49 = vsel %vm749_vm5, %v767_v44, %v766_v47  ;;  %v773_v46 = vrot.slane %v740_v13, 2  ;;  %v775_v52 = vrot.slane %v741_v41, 1 }
 0x12a   : > { %v770_v31 = vsel %vm752_vm6, %v769_v3, %v768_v49 }
 0x12b   : > { %v772_v51 = vsel %vm755_vm7, %v771_v50, %v770_v31 }
 0x12c   : > { %v774_v58 = vsel %vm758_vm8, %v773_v46, %v772_v51 }
 0x12d   : > { %v776_v37 = vsel %vm761_vm9, %v775_v52, %v774_v58 }
 0x12e   : > { %v1868_v55 = vpack.c.b16 %v776_v37, %v762_v48 }
 0x130   : > { %778 = vrot.lane.b32.xlu0 %v1868_v55, %s1597_s10 }
 0x1a2   : > { %v779_v56 = vpop.permute.xlu0 %778 }
 0x1a3   : > { %1415 = vmatprep.subr.msk.bf16.mxu1 %vm780_vm2, %v779_v56  ;;  %v794_v57 = vsel %vm780_vm2, %v779_v56, 0 }
 0x1a4   : > { %1385 = vmatpush3.bf16.xpose.msra.mxu1 %v794_v57 }
 0x1ab   : > { %1387 = vmatmul.mubr.msk.bf16.vlgmr.msra.gmra.mrb[0].mxu1 %vm780_vm2, %v691_v45 }
 0x1ac   : > { %1390 = vmatprep.mubr.msk.bf16.mxu1 %vm780_vm2, %v692_v27 }
 0x1b3   : > { %1391 = vmatmul.mubr.msk.bf16.gmra.mrb[4].mxu1 %vm780_vm2, %v693_v53 }
 0x27e   : > { %v1388_v60 = vpop.f32.mrb[0].mxu1 }
 0x27f   : > { %v830_v61 = vpop.f32.mrb[1].mxu1  ;;  %v868_v63 = vsel %vm861_vm10, %v1388_v60, -inf }
 0x280   : > { %869 = vmax.xlane.f32.xlu1 %v868_v63  ;;  %v1389_v0 = vpop.f32.mrb[2].mxu1  ;;  %v862_v30 = vsel %vm861_vm10, %v830_v61, -inf }
 0x281   : > { %863 = vmax.xlane.f32.xlu0 %v862_v30  ;;  %v833_v36 = vpop.f32.mrb[3].mxu1  ;;  %v871_v45 = vsel %vm861_vm10, %v1389_v0, -inf }
 0x282   : > { %v865_v4 = vsel %vm861_vm10, %v833_v36, -inf }
 0x284   : > { %872 = vmax.xlane.f32.xlu1 %v871_v45 }
 0x286   : > { %v1392_v39 = vpop.f32.mrb[4].mxu1 }
 0x287   : > { %v846_v62 = vpop.f32.mrb[5].mxu1  ;;  %v880_v27 = vsel %vm861_vm10, %v1392_v39, -inf }
 0x288   : > { %866 = vmax.xlane.f32.xlu1 %v865_v4  ;;  %v1393_v40 = vpop.f32.mrb[6].mxu1  ;;  %v874_v1 = vsel %vm861_vm10, %v846_v62, -inf }
 0x289   : > { %v849_v53 = vpop.f32.mrb[7].mxu1  ;;  %v883_v7 = vsel %vm861_vm10, %v1393_v40, -inf }
 0x28a   : > { %v877_v6 = vsel %vm861_vm10, %v849_v53, -inf }
 0x28c   : > { %881 = vmax.xlane.f32.xlu1 %v880_v27 }
 0x290   : > { %875 = vmax.xlane.f32.xlu1 %v874_v1 }
 0x294   : > { %878 = vmax.xlane.f32.xlu1 %v877_v6 }
 0x298   : > { %884 = vmax.xlane.f32.xlu1 %v883_v7 }
 0x30d   : > { %v870_v2 = vpop.xlane.xlu1 %869 }
 0x30e   : > { %v888_v8 = vsub.f32 %v1388_v60, %v870_v2  ;;  %v864_v9 = vpop.xlane.xlu0 %863 }
 0x30f   : > { %v886_v17 = vsub.f32 %v830_v61, %v864_v9 }
 0x310   : > { %v898_v5 = vmul.f32 1.442695, %v888_v8 }
 0x311   : > { %v894_v54 = vmul.f32 1.442695, %v886_v17  ;;  %v873_v18 = vpop.xlane.xlu1 %872 }
 0x312   : > { %1492 = vpow2.f32 %v898_v5  ;;  %v889_v21 = vsub.f32 %v1389_v0, %v873_v18 }
 0x313   : > { %1494 = vpow2.f32 %v894_v54 }
 0x314   : > { %v900_v59 = vmul.f32 1.442695, %v889_v21 }
 0x315   : > { %v867_v22 = vpop.xlane.xlu1 %866 }
 0x316   : > { %v887_v23 = vsub.f32 %v833_v36, %v867_v22 }
 0x318   : > { %v896_v24 = vmul.f32 1.442695, %v887_v23 }
 0x319   : > { %v882_v25 = vpop.xlane.xlu1 %881 }
 0x31a   : > { %1496 = vpow2.f32 %v896_v24  ;;  %v892_v32 = vsub.f32 %v1392_v39, %v882_v25 }
 0x31b   : > { %1498 = vpow2.f32 %v900_v59 }
 0x31c   : > { %v1893_v33 = vpop.eup %1492  ;;  %v906_v34 = vmul.f32 1.442695, %v892_v32  ;;  %v1038_v32 = vld [vmem:[%s1993_s3] sm:$0x3] }
 0x31d   : > { %v1495_v35 = vpop.eup %1494  ;;  %v876_v13 = vpop.xlane.xlu1 %875  ;;  %v916_v41 = vsel %vm861_vm10, %v1893_v33, 0.0  ;;  %1416 = vmatprep.subr.msk.bf16.mxu1 %vm1058_vm11, %v1038_v32 }
 0x31e   : > { %1500 = vpow2.f32 %v906_v34  ;;  %v890_v38 = vsub.f32 %v846_v62, %v876_v13  ;;  %917 = vadd.xlane.f32.xlu0 %v916_v41  ;;  %v910_v42 = vsel %vm861_vm10, %v1495_v35, 0.0 }
 0x31f   : > { %911 = vadd.xlane.f32.xlu1 %v910_v42 }
 0x320   : > { %v902_v43 = vmul.f32 1.442695, %v890_v38 }
 0x321   : > { %v879_v44 = vpop.xlane.xlu1 %878 }
 0x322   : > { %1502 = vpow2.f32 %v902_v43  ;;  %v891_v26 = vsub.f32 %v849_v53, %v879_v44 }
 0x324   : > { %v1497_v29 = vpop.eup %1496  ;;  %v904_v3 = vmul.f32 1.442695, %v891_v26 }
 0x325   : > { %v885_v28 = vpop.xlane.xlu1 %884  ;;  %v913_v47 = vsel %vm861_vm10, %v1497_v29, 0.0  ;;  %v1499_v48 = vpop.eup %1498 }
 0x326   : > { %1504 = vpow2.f32 %v904_v3  ;;  %v893_v49 = vsub.f32 %v1393_v40, %v885_v28  ;;  %914 = vadd.xlane.f32.xlu1 %v913_v47  ;;  %v919_v51 = vsel %vm861_vm10, %v1499_v48, 0.0  ;;  %v1340_v47 = vld [vmem:[%s1994_s4] ss:$0 sm:$0xff] }
 0x328   : > { %v1501_v50 = vpop.eup %1500  ;;  %v908_v31 = vmul.f32 1.442695, %v893_v49 }
 0x329   : > { %v928_v46 = vsel %vm861_vm10, %v1501_v50, 0.0 }
 0x32a   : > { %1506 = vpow2.f32 %v908_v31  ;;  %929 = vadd.xlane.f32.xlu0 %v928_v46  ;;  %920 = vadd.xlane.f32.xlu1 %v919_v51 }
 0x32c   : > { %v1503_v52 = vpop.eup %1502 }
 0x32d   : > { %v922_v58 = vsel %vm861_vm10, %v1503_v52, 0.0 }
 0x32e   : > { %923 = vadd.xlane.f32.xlu0 %v922_v58 }
 0x330   : > { %v1505_v37 = vpop.eup %1504 }
 0x331   : > { %v925_v56 = vsel %vm861_vm10, %v1505_v37, 0.0 }
 0x332   : > { %926 = vadd.xlane.f32.xlu1 %v925_v56 }
 0x334   : > { %v1507_v57 = vpop.eup %1506 }
 0x335   : > { %v931_v60 = vsel %vm861_vm10, %v1507_v57, 0.0 }
 0x336   : > { %932 = vadd.xlane.f32.xlu1 %v931_v60 }
 0x344   : > { %954 = vrot.lane.b32.xlu0 %v1868_v55, %s1598_s11  ;;  %s1156_s11 = scalar_lea.vmem (%p1691_p7), %s1995_s5, %s1349_s18 }
 0x3ab   : > { %v918_v63 = vpop.xlane.xlu0 %917 }
 0x3ac   : > { %v912_v61 = vpop.xlane.xlu1 %911 }
 0x3ad   : > { %1508 = vrcp.f32 %v912_v61 }
 0x3b3   : > { %v915_v0 = vpop.xlane.xlu1 %914 }
 0x3b4   : > { %1510 = vrcp.f32 %v915_v0 }
 0x3b5   : > { %1512 = vrcp.f32 %v918_v63 }
 0x3b7   : > { %v930_v30 = vpop.xlane.xlu0 %929  ;;  %v921_v36 = vpop.xlane.xlu1 %920 }
 0x3b8   : > { %1514 = vrcp.f32 %v921_v36  ;;  %v1509_v39 = vpop.eup %1508 }
 0x3b9   : > { %v942_v53 = vmul.f32 %v1509_v39, %v1495_v35 }
 0x3bb   : > { %v924_v45 = vpop.xlane.xlu0 %923 }
 0x3bc   : > { %1516 = vrcp.f32 %v924_v45 }
 0x3be   : > { %v1511_v62 = vpop.eup %1510 }
 0x3bf   : > { %v955_v4 = vpop.permute.xlu0 %954  ;;  %v927_v40 = vpop.xlane.xlu1 %926  ;;  %v943_v27 = vmul.f32 %v1511_v62, %v1497_v29 }
 0x3c0   : > { %1518 = vrcp.f32 %v927_v40  ;;  %1394 = vmatprep.subr.bf16.mxu0 %v955_v4  ;;  %v1513_v55 = vpop.eup %1512 }
 0x3c1   : > { %1395 = vmatpush3.bf16.msra.mxu0 %v955_v4  ;;  %v950_v1 = vpack.c.bf16 %v943_v27, %v942_v53  ;;  %1520 = vrcp.f32 %v930_v30  ;;  %v944_v2 = vmul.f32 %v1513_v55, %v1893_v33  ;;  %v1060_v33 = vsel %vm1058_vm11, %v1038_v32, 0 }
 0x3c2   : > { %v1515_v6 = vpop.eup %1514  ;;  %1405 = vmatpush3.bf16.msra.mxu1 %v1060_v33 }
 0x3c3   : > { %1396 = vmatprep.mubr.msk.bf16.mxu0 %vm861_vm10, %v950_v1  ;;  %v933_v7 = vpop.xlane.xlu1 %932  ;;  %v945_v8 = vmul.f32 %v1515_v6, %v1499_v48 }
 0x3c4   : > { %1522 = vrcp.f32 %v933_v7 }
 0x3c5   : > { %v951_v9 = vpack.c.bf16 %v945_v8, %v944_v2 }
 0x3c6   : > { %v1517_v17 = vpop.eup %1516 }
 0x3c7   : > { %1397 = vmatmul.mubr.msk.bf16.vlgmr.msra.gmra.mrb[8].mxu0 %vm861_vm10, %v951_v9  ;;  %v946_v54 = vmul.f32 %v1517_v17, %v1503_v52 }
 0x3ca   : > { %v1519_v5 = vpop.eup %1518 }
 0x3cb   : > { %v947_v18 = vmul.f32 %v1519_v5, %v1505_v37  ;;  %v1521_v21 = vpop.eup %1520 }
 0x3cc   : > { %v948_v59 = vmul.f32 %v1521_v21, %v1501_v50 }
 0x3cd   : > { %v952_v22 = vpack.c.bf16 %v947_v18, %v946_v54 }
 0x3ce   : > { %v1523_v23 = vpop.eup %1522 }
 0x3cf   : > { %1400 = vmatprep.mubr.msk.bf16.mxu0 %vm861_vm10, %v952_v22  ;;  %v949_v24 = vmul.f32 %v1523_v23, %v1507_v57 }
 0x3d1   : > { %v953_v25 = vpack.c.bf16 %v949_v24, %v948_v59 }
 0x3d3   : > { %1401 = vmatmul.mubr.msk.bf16.gmra.mrb[12].mxu0 %vm861_vm10, %v953_v25 }
 0x49a   : > { %v1398_v34 = vpop.f32.mrb[8].mxu0 }
 0x49b   : > { %v1003_v35 = vpop.f32.mrb[9].mxu0 }
 0x49c   : > { %v1399_v13 = vpop.f32.mrb[10].mxu0 }
 0x49d   : > { %v1035_v41 = vpack.c.bf16 %v1399_v13, %v1398_v34  ;;  %v1006_v38 = vpop.f32.mrb[11].mxu0 }
 0x49e   : > { %v1034_v42 = vpack.c.bf16 %v1006_v38, %v1003_v35 }
 0x4a0   : > { %1406 = vmatprep.mubr.msk.bf16.mxu1 %vm780_vm2, %v1034_v42 }
 0x4a1   : > { %1407 = vmatmul.mubr.msk.bf16.vlgmr.msra.gmra.mrb[8].mxu1 %vm780_vm2, %v1035_v41 }
 0x4a6   : > { %v1402_v43 = vpop.f32.mrb[12].mxu0 }
 0x4a7   : > { %v1019_v44 = vpop.f32.mrb[13].mxu0 }
 0x4a8   : > { %v1403_v26 = vpop.f32.mrb[14].mxu0 }
 0x4a9   : > { %v1037_v29 = vpack.c.bf16 %v1403_v26, %v1402_v43  ;;  %v1022_v3 = vpop.f32.mrb[15].mxu0 }
 0x4aa   : > { %v1036_v28 = vpack.c.bf16 %v1022_v3, %v1019_v44 }
 0x4ac   : > { %1410 = vmatprep.mubr.msk.bf16.mxu1 %vm780_vm2, %v1036_v28 }
 0x4ad   : > { %1411 = vmatmul.mubr.msk.bf16.gmra.mrb[12].mxu1 %vm780_vm2, %v1037_v29 }
 0x574   : > { %v1408_v48 = vpop.f32.mrb[8].mxu1 }
 0x575   : > { %v1105_v49 = vadd.f32 %v1408_v48, %v1340_v47  ;;  %v1096_v50 = vpop.f32.mrb[9].mxu1 }
 0x576   : > { %v1097_v31 = vadd.f32 %v1340_v47, %v1096_v50  ;;  %v1409_v46 = vpop.f32.mrb[10].mxu1 }
 0x577   : > { %v1129_v51 = vadd.f32 %v1105_v49, %v1730_v12  ;;  %v1108_v52 = vadd.f32 %v1409_v46, %v1340_v47  ;;  %v1099_v58 = vpop.f32.mrb[11].mxu1 }
 0x578   : > { %v1127_v37 = vadd.f32 %v1097_v31, %v1726_v10  ;;  %v1100_v56 = vadd.f32 %v1340_v47, %v1099_v58 }
 0x579   : > { %1137 = vst.msk [vmem:[%s1923_s16 + $0x10] sm:$0xff] %vm336_vm1, %v1129_v51  ;;  %v1130_v57 = vadd.f32 %v1108_v52, %v1734_v14 }
 0x57a   : > { %1135 = vst.msk [vmem:[%s1923_s16] sm:$0xff] %vm336_vm1, %v1127_v37  ;;  %v1128_v12 = vadd.f32 %v1100_v56, %v1728_v11 }
 0x57b   : > { %1138 = vst.msk [vmem:[%s1923_s16 + $0x18] sm:$0xff] %vm336_vm1, %v1130_v57 }
 0x57c   : > { %1136 = vst.msk [vmem:[%s1923_s16 + $0x8] sm:$0xff] %vm336_vm1, %v1128_v12 }
 0x580   : > { %v1412_v10 = vpop.f32.mrb[12].mxu1 }
 0x581   : > { %v1121_v60 = vadd.f32 %v1412_v10, %v1340_v47  ;;  %v1112_v61 = vpop.f32.mrb[13].mxu1 }
 0x582   : > { %v1113_v63 = vadd.f32 %v1340_v47, %v1112_v61  ;;  %v1413_v0 = vpop.f32.mrb[14].mxu1  ;;  %1149 = sbr.rel (!%p1691_p7) target bundleno = 1425 (0x591), region = 82 }
 0x583   : > { %v1133_v30 = vadd.f32 %v1121_v60, %v1747_v19  ;;  %v1124_v36 = vadd.f32 %v1413_v0, %v1340_v47  ;;  %v1115_v14 = vpop.f32.mrb[15].mxu1  ;;  %v1202_v19 = vld [vmem:[%s1923_s16 + $0x10] sm:$0xff] (%p1691_p7) }
 0x584   : > { %v1131_v45 = vadd.f32 %v1113_v63, %v1736_v15  ;;  %v1116_v39 = vadd.f32 %v1340_v47, %v1115_v14  ;;  %v1198_v15 = vld [vmem:[%s1923_s16] sm:$0xff] (%p1691_p7)  ;;  %1203 = vst [vmem:[%s1156_s11 + $0x20] sm:$0xff] (%p1691_p7), %v1202_v19 }
 0x585   : > { %1141 = vst.msk [vmem:[%s1923_s16 + $0x30] sm:$0xff] %vm336_vm1, %v1133_v30  ;;  %v1134_v11 = vadd.f32 %v1124_v36, %v1749_v20  ;;  %v1204_v20 = vld [vmem:[%s1923_s16 + $0x18] sm:$0xff] (%p1691_p7)  ;;  %1199 = vst [vmem:[%s1156_s11] sm:$0xff] (%p1691_p7), %v1198_v15 }
 0x586   : > { %1139 = vst.msk [vmem:[%s1923_s16 + $0x20] sm:$0xff] %vm336_vm1, %v1131_v45  ;;  %v1132_v62 = vadd.f32 %v1116_v39, %v1738_v16  ;;  %v1200_v16 = vld [vmem:[%s1923_s16 + $0x8] sm:$0xff] (%p1691_p7)  ;;  %1205 = vst [vmem:[%s1156_s11 + $0x30] sm:$0xff] (%p1691_p7), %v1204_v20 }
 0x587   : > { %1142 = vst.msk [vmem:[%s1923_s16 + $0x38] sm:$0xff] %vm336_vm1, %v1134_v11  ;;  %1201 = vst [vmem:[%s1156_s11 + $0x10] sm:$0xff] (%p1691_p7), %v1200_v16 }
 0x588   : > { %1140 = vst.msk [vmem:[%s1923_s16 + $0x28] sm:$0xff] %vm336_vm1, %v1132_v62 }
 0x58c   : > { %v1210_v53 = vld [vmem:[%s1923_s16 + $0x30] sm:$0xff] }
 0x58d   : > { %v1206_v4 = vld [vmem:[%s1923_s16 + $0x20] sm:$0xff]  ;;  %1211 = vst [vmem:[%s1156_s11 + $0x60] sm:$0xff] %v1210_v53 }
 0x58e   : > { %v1212_v27 = vld [vmem:[%s1923_s16 + $0x38] sm:$0xff]  ;;  %1207 = vst [vmem:[%s1156_s11 + $0x40] sm:$0xff] %v1206_v4 }
 0x58f   : > { %v1208_v40 = vld [vmem:[%s1923_s16 + $0x28] sm:$0xff]  ;;  %1213 = vst [vmem:[%s1156_s11 + $0x70] sm:$0xff] %v1212_v27 }
 0x590   : > { %1209 = vst [vmem:[%s1156_s11 + $0x50] sm:$0xff] %v1208_v40 }
 0x591 PF: > { %s15_s26 = sadd.s32 1, %s1594_s26   ;;  %s1998_s18 = smov %s1566_s19 }
 0x592   : > { %p12_p13 = scmp.ge.s32.totalorder %s15_s26, 10   ;;  %s1999_s19 = smov %s1705_s14 }
 0x593   : > { %s2000_s20 = smov %s1582_s23  ;;  %s2001_s21 = smov %s1586_s24 }
 0x594   : > { %s2002_s22 = smov %s1590_s25  ;;  %s2003_s23 = smov %s2007_s27 }
 0x595   : > { %s2004_s24 = smov %s2011_s28  ;;  %s2005_s25 = smov %s2015_s30 }
 0x596   :  { %14 = sbr.rel (!%p12_p13) target bundleno = 5 (0x5), region = 151 }

</bundles_post_ra>
